<compile_context>
chip_gen: v7x
topology: tpu7x:2x2x1
jax: 0.10.0
libtpu: 0.0.40
codegen_flags: <defaults>
</compile_context>

<pallas_src>
import jax
import jax.numpy as jnp
from jax.experimental import pallas as pl
from jax.experimental.pallas import tpu as pltpu

IN_FEATURES = 16
OUT_FEATURES = 16
_PACK = 128 // OUT_FEATURES          # 8 original rows per 128-lane packed row
_LANES = _PACK * OUT_FEATURES        # 128

# Gridless path handles up to this many *packed* rows resident in VMEM:
# 8192 packed rows -> 3 * 8192*128*4B = 12 MiB (+64 KiB weight), well under the
# 32 MiB default scoped VMEM limit on every generation (v5e/v6e/v7x).
_SINGLE_BLOCK_MAX_BP = 8192

# Max packed rows per grid step on the tiled path. 8192 packed rows -> each
# f32 operand tile is 4 MiB; 3 streamed operands x 2 pipeline buffers ~= 24 MiB,
# still under the 32 MiB default scoped limit. ~12 MiB HBM traffic per step
# amortizes the ~0.35 us per-step pipeline overhead on all generations.
_MAX_TILE_BP = 8192


def _linear_add_relu_kernel(x_ref, w_ref, b_ref, other_ref, o_ref):
    # x:     (TB, 128)  lane-packed (8 original rows per packed row)
    # w:     (128, 128) block-diagonal (8 copies of wt on the diagonal)
    # b:     (1, 128)   bias tiled 8x along lanes
    # other: (TB, 128)  lane-packed, or (1, 128) when row-broadcast
    y = jnp.dot(x_ref[...], w_ref[...], preferred_element_type=jnp.float32)  # MXU
    y = y + b_ref[...] + other_ref[...]                                      # VPU f32
    o_ref[...] = jnp.maximum(y, 0.0).astype(o_ref.dtype)


def _round_up(n, m):
    return (n + m - 1) // m * m


def linear_add_relu(x, w, b, other):
    """Fused y = relu(x @ w.T + b + other), lane-packed for TPU.

    x:     (B, 16) float32
    w:     (16, 16) torch-style weight (OUT, IN)
    b:     (16,)
    other: broadcastable to (B, 16)
    """
    x = jnp.asarray(x, jnp.float32)
    other = jnp.asarray(other, jnp.float32)
    B = x.shape[0]

    # ---- one-time layout work in the wrapper (never inside the kernel) ----
    wt = jnp.asarray(w, jnp.float32).T                           # (IN, OUT)
    # Block-diagonal weight: (BP,128) @ (128,128) computes 8 independent
    # 16-wide GEMVs per packed row on a proper 128x128 MXU shape.
    w_bd = jnp.kron(jnp.eye(_PACK, dtype=jnp.float32), wt)       # (128, 128)
    b_tiled = jnp.tile(jnp.asarray(b, jnp.float32).reshape(1, OUT_FEATURES),
                       (1, _PACK))                                # (1, 128)

    # Lane-pack x: pad B to a multiple of 8, reshape (Bp,16)->(Bp/8,128).
    # Contiguous reshape (free) that makes every VMEM tile lane-dense.
    Bp = _round_up(max(B, 1), _PACK)
    if Bp != B:
        x = jnp.pad(x, ((0, Bp - B), (0, 0)))
    xp = x.reshape(Bp // _PACK, _LANES)                           # (BP, 128)
    BP = xp.shape[0]

    # `other`: avoid materializing a broadcast when it is row-invariant; pass
    # it as a grid-invariant (1,128) tile and broadcast on the VPU in-kernel.
    if other.ndim == 0 or other.shape in ((OUT_FEATURES,), (1, OUT_FEATURES)):
        other_p = jnp.tile(jnp.broadcast_to(other, (1, OUT_FEATURES)),
                           (1, _PACK))                            # (1, 128)
        other_rowwise = False
    else:
        o2 = jnp.broadcast_to(other, (B, OUT_FEATURES))
        if Bp != B:
            o2 = jnp.pad(o2, ((0, Bp - B), (0, 0)))
        other_p = o2.reshape(BP, _LANES)                          # (BP, 128)
        other_rowwise = True

    out_shape = jax.ShapeDtypeStruct((BP, _LANES), jnp.float32)
    cost = pl.CostEstimate(
        flops=2 * B * IN_FEATURES * OUT_FEATURES,
        transcendentals=0,
        bytes_accessed=(xp.size + other_p.size + BP * _LANES
                        + w_bd.size + b_tiled.size) * 4,
    )

    if BP <= _SINGLE_BLOCK_MAX_BP:
        # Launch/overhead-bound regime: no grid, whole operands resident in VMEM.
        vmem = pl.BlockSpec(memory_space=pltpu.MemorySpace.VMEM)
        out_p = pl.pallas_call(
            _linear_add_relu_kernel,
            out_shape=out_shape,
            in_specs=[vmem, vmem, vmem, vmem],
            out_specs=vmem,
            cost_estimate=cost,
        )(xp, w_bd, b_tiled, other_p)
    else:
        # Large-batch path: tile over packed rows; keep >= 4 grid steps so
        # dimension_semantics=("parallel",) can shard across both v7x TCs.
        tile_bp = min(_MAX_TILE_BP, _round_up(pl.cdiv(BP, 4), 8))
        grid = (pl.cdiv(BP, tile_bp),)
        other_spec = (
            pl.BlockSpec((tile_bp, _LANES), lambda i: (i, 0))
            if other_rowwise else
            pl.BlockSpec((1, _LANES), lambda i: (0, 0))
        )
        out_p = pl.pallas_call(
            _linear_add_relu_kernel,
            out_shape=out_shape,
            grid=grid,
            in_specs=[
                pl.BlockSpec((tile_bp, _LANES), lambda i: (i, 0)),
                pl.BlockSpec((_LANES, _LANES), lambda i: (0, 0)),
                pl.BlockSpec((1, _LANES), lambda i: (0, 0)),
                other_spec,
            ],
            out_specs=pl.BlockSpec((tile_bp, _LANES), lambda i: (i, 0)),
            compiler_params=pltpu.CompilerParams(
                dimension_semantics=("parallel",),
            ),
            cost_estimate=cost,
        )(xp, w_bd, b_tiled, other_p)

    out = out_p.reshape(Bp, OUT_FEATURES)
    return out[:B] if Bp != B else out


if __name__ == "__main__":
    key = jax.random.PRNGKey(0)
    kx, ko, kw, kb = jax.random.split(key, 4)

    # Deterministic parameter init (mimics torch.nn.Linear's U(-1/sqrt(in), 1/sqrt(in)))
    bound = 1.0 / (IN_FEATURES ** 0.5)
    w = jax.random.uniform(kw, (OUT_FEATURES, IN_FEATURES), jnp.float32,
                           minval=-bound, maxval=bound)
    b = jax.random.uniform(kb, (OUT_FEATURES,), jnp.float32,
                           minval=-bound, maxval=bound)

    # Inputs matching the module spec: x1 = randn(2, 16), other same shape.
    x1 = jax.random.normal(kx, (2, IN_FEATURES), jnp.float32)
    other = jax.random.normal(ko, (2, OUT_FEATURES), jnp.float32)

    out = linear_add_relu(x1, w, b, other)
    jax.block_until_ready(out)

    # Reference check in plain JAX.
    ref = jnp.maximum(x1 @ w.T + b + other, 0.0)
    assert out.shape == ref.shape, "shape mismatch vs reference"
    assert jnp.allclose(out, ref, atol=1e-5, rtol=1e-5), "mismatch vs reference"

    # Also exercise the padded-batch and row-broadcast `other` paths.
    x2 = jax.random.normal(kx, (37, IN_FEATURES), jnp.float32)
    other_vec = jax.random.normal(ko, (OUT_FEATURES,), jnp.float32)
    out2 = linear_add_relu(x2, w, b, other_vec)
    jax.block_until_ready(out2)
    ref2 = jnp.maximum(x2 @ w.T + b + other_vec, 0.0)
    assert jnp.allclose(out2, ref2, atol=1e-5, rtol=1e-5), "mismatch (bcast path)"

    print("KERNEL_OK")
</pallas_src>

<mosaic_0001>
module attributes {stable_mosaic.version = 11 : i64} {
  func.func @_linear_add_relu_kernel(%arg0: memref<1x128xf32, #tpu.memory_space<vmem>>, %arg1: memref<128x128xf32, #tpu.memory_space<vmem>>, %arg2: memref<1x128xf32, #tpu.memory_space<vmem>>, %arg3: memref<1x128xf32, #tpu.memory_space<vmem>>, %arg4: memref<1x128xf32, #tpu.memory_space<vmem>>) attributes {dimension_semantics = [], scalar_prefetch = 0 : i64, scratch_operands = 0 : i64, tpu.core_type = #tpu.core_type<tc>} {
    %c0 = arith.constant 0 : index
    %c0_0 = arith.constant 0 : index
    %0 = vector.load %arg0[%c0, %c0_0] : memref<1x128xf32, #tpu.memory_space<vmem>>, vector<1x128xf32>
    %c0_1 = arith.constant 0 : index
    %c0_2 = arith.constant 0 : index
    %1 = vector.load %arg1[%c0_1, %c0_2] : memref<128x128xf32, #tpu.memory_space<vmem>>, vector<128x128xf32>
    %cst = arith.constant dense<0.000000e+00> : vector<1x128xf32>
    %2 = tpu.matmul %0, %1, %cst {dimension_numbers = #tpu.dot_dimension_numbers<[1], [0], [0], [1], [0, 0, 1, 1], [], []>} : vector<1x128xf32>, vector<128x128xf32>, vector<1x128xf32> -> vector<1x128xf32>
    %c0_3 = arith.constant 0 : index
    %c0_4 = arith.constant 0 : index
    %3 = vector.load %arg2[%c0_3, %c0_4] : memref<1x128xf32, #tpu.memory_space<vmem>>, vector<1x128xf32>
    %4 = arith.addf %2, %3 : vector<1x128xf32>
    %c0_5 = arith.constant 0 : index
    %c0_6 = arith.constant 0 : index
    %5 = vector.load %arg3[%c0_5, %c0_6] : memref<1x128xf32, #tpu.memory_space<vmem>>, vector<1x128xf32>
    %6 = arith.addf %4, %5 : vector<1x128xf32>
    %cst_7 = arith.constant 0.000000e+00 : f32
    %7 = vector.broadcast %cst_7 : f32 to vector<1x128xf32>
    %8 = arith.maximumf %6, %7 : vector<1x128xf32>
    %c0_8 = arith.constant 0 : index
    %c0_9 = arith.constant 0 : index
    %9 = vector.load %arg4[%c0_8, %c0_9] : memref<1x128xf32, #tpu.memory_space<vmem>>, vector<1x128xf32>
    tpu.vector_store %arg4[%c0_8, %c0_9], %8 {strides = array<i32>} : memref<1x128xf32, #tpu.memory_space<vmem>>, vector<1x128xf32>,
    return
  }
}

</mosaic_0001>

<bundles_post_ra>
// kernel: tpu_custom_call.1
= control target key start
LH: loop header
LB: loop body
LE: loop exit
PB: predicated region body
PF: predicated region fallthrough
CT: control target
= control target key end

     0   :  { %9 = vsyncpa [#allocation3], 0  ;;  %s390_s0 = inlined_call_operand.hbm [shape: f32[1,128], index: 0, kind: input, shape index: {}]   ;;  %s391_s1 = inlined_call_operand.hbm [shape: f32[128,128], index: 1, kind: input, shape index: {}]   ;;  %s392_s2 = inlined_call_operand.vmem [shape: f32[1,128], index: 2, kind: input, shape index: {}]   ;;  %s393_s3 = inlined_call_operand.vmem [shape: f32[1,128], index: 3, kind: input, shape index: {}]   ;;  %s394_s4 = inlined_call_operand.hbm [shape: f32[1,128], index: 4, kind: output, shape index: {}]  }
   0x1   :  { %10 = vsyncpa [#allocation6], 0 }
   0x2   :  { %11 = vsyncpa [#allocation4], 0  ;;  %s308_s15 = smov [#allocation2]   ;;  %s309_s17 = smov [#allocation5]  }
   0x3   :  { %s18_s16 = sshll.u32 %s308_s15, 4  ;;  %s27_s18 = sshll.u32 %s309_s17, 4  ;;  %s19_s16 = int_to_ptr.vmem [resolvable:$true] %s18_s16  ;;  %s341_s18 = int_to_ptr.vmem [resolvable:$true] %s27_s18 }
   0x4   :  { %s236_s21 = scalar_lea.hbm %s390_s0, 16 }
   0x5   :  { %p237_p0 = scmp.ne.s32.totalorder %s390_s0, %s236_s21  ;;  %p240_p1 = scmp.lt.u32.totalorder %s236_s21, %s390_s0 }
   0x7   :  { %p242_p2 = pnand %p240_p1, %p237_p0 }
   0x9   :  { %245 = shalt.err (!%p242_p2)
}
   0xa   :  { %s246_s26 = scalar_lea.vmem %s19_s16, 16  ;;  %s250_s27 = scalar_lea.vmem %s19_s16, 32 }
   0xb   :  { %p247_p3 = scmp.ne.s32.totalorder %s19_s16, %s246_s26  ;;  %p251_p4 = scmp.lt.s32.totalorder %s19_s16, %s19_s16 }
   0xc   :  { %p252_p5 = scmp.lt.s32.totalorder %s250_s27, %s246_s26 }
   0xe   :  { %p253_p6 = por %p252_p5, %p251_p4 }
  0x10   :  { %p254_p7 = pnand %p253_p6, %p247_p3 }
  0x12   :  { %257 = shalt.err (!%p254_p7)
}
  0x13   :  { %21 = dma.hbm_to_vmem [thread:$0]  %s390_s0, 16, %s19_s16, [#allocation3]  }
  0x14   :  { %s258_s6 = scalar_lea.hbm %s391_s1, 2048 }
  0x15   :  { %p259_p8 = scmp.ne.s32.totalorder %s391_s1, %s258_s6  ;;  %p262_p9 = scmp.lt.u32.totalorder %s258_s6, %s391_s1 }
  0x17   :  { %p264_p10 = pnand %p262_p9, %p259_p8 }
  0x19   :  { %267 = shalt.err (!%p264_p10)
}
  0x1a   :  { %s268_s11 = scalar_lea.vmem %s341_s18, 2048  ;;  %p273_p12 = scmp.lt.s32.totalorder %s341_s18, %s341_s18 }
  0x1b   :  { %p269_p11 = scmp.ne.s32.totalorder %s341_s18, %s268_s11  ;;  %p274_p13 = scmp.lt.s32.totalorder %s268_s11, %s268_s11 }
  0x1d   :  { %p275_p0 = por %p274_p13, %p273_p12 }
  0x1f   :  { %p276_p1 = pnand %p275_p0, %p269_p11 }
  0x21   :  { %279 = shalt.err (!%p276_p1)
}
  0x22   :  { %s310_s0 = smov 128   ;;  %s311_s12 = smov 8  }
  0x23   :  { %33 = dma.hbm_to_vmem [thread:$0]  %s391_s1, 2048, %s341_s18, [#allocation6], %s310_s0, %s310_s0, %s311_s12  }
  0x24   :  { %302 = dma.done.wait [#allocation3], 16  }
  0x25   :  { %303 = vsyncadd [#allocation3], 4294967280 }
  0x26   :  { %304 = dma.done.wait [#allocation6], 2048  }
  0x27   :  { %305 = vsyncadd [#allocation6], 4294965248  ;;  %v312_v0 = vmov 0.0|0.0   ;;  %vm313_vm0 = vmmov 0   ;;  %v314_v1 = vmov 0.0   ;;  %v45_v2 = vld [vmem:[#allocation5] sm:$0xff] }
  0x28   :  { %204 = vmatprep.subr.bf16.mxu0 %v312_v0  ;;  %201 = vmatprep.mubr.msk.f32.mxu0 %vm313_vm0, %v314_v1  ;;  %v46_v3 = vld [vmem:[#allocation5 + $0x8] sm:$0xff]  ;;  %v47_v4 = vld [vmem:[#allocation5 + $0x10] sm:$0xff]  ;;  %v48_v6 = vld [vmem:[#allocation5 + $0x18] sm:$0xff]  ;;  %s315_s18 = smov [#allocation7]  }
  0x29   :  { %v205_v5 = vpack.c.bf16 %v46_v3, %v45_v2  ;;  %v208_v7 = vpack.c.bf16 %v48_v6, %v47_v4  ;;  %v49_v8 = vld [vmem:[#allocation5 + $0x20] sm:$0xff]  ;;  %v50_v9 = vld [vmem:[#allocation5 + $0x28] sm:$0xff]  ;;  %v51_v11 = vld [vmem:[#allocation5 + $0x30] sm:$0xff]  ;;  %s142_s19 = sshll.u32 %s315_s18, 4  ;;  %s143_s19 = int_to_ptr.vmem [resolvable:$true] %s142_s19 }
  0x2a   :  { %v211_v10 = vpack.c.bf16 %v50_v9, %v49_v8  ;;  %v52_v12 = vld [vmem:[#allocation5 + $0x38] sm:$0xff]  ;;  %v53_v14 = vld [vmem:[#allocation5 + $0x40] sm:$0xff]  ;;  %v54_v15 = vld [vmem:[#allocation5 + $0x48] sm:$0xff]  ;;  %s280_s20 = scalar_lea.vmem %s143_s19, 16  ;;  %s284_s21 = scalar_lea.vmem %s143_s19, 32 }
  0x2b   :  { %206 = vmatpush3.bf16.msra.mxu0 %v205_v5  ;;  %v214_v13 = vpack.c.bf16 %v52_v12, %v51_v11  ;;  %v217_v16 = vpack.c.bf16 %v54_v15, %v53_v14  ;;  %v55_v17 = vld [vmem:[#allocation5 + $0x50] sm:$0xff]  ;;  %v56_v18 = vld [vmem:[#allocation5 + $0x58] sm:$0xff]  ;;  %v57_v20 = vld [vmem:[#allocation5 + $0x60] sm:$0xff]  ;;  %p281_p2 = scmp.ne.s32.totalorder %s143_s19, %s280_s20  ;;  %p285_p3 = scmp.lt.s32.totalorder %s143_s19, %s143_s19 }
  0x2c   :  { %207 = vmatprep.subr.bf16.mxu0 %v312_v0  ;;  %v220_v19 = vpack.c.bf16 %v56_v18, %v55_v17  ;;  %v58_v21 = vld [vmem:[#allocation5 + $0x68] sm:$0xff]  ;;  %v59_v23 = vld [vmem:[#allocation5 + $0x70] sm:$0xff]  ;;  %v60_v24 = vld [vmem:[#allocation5 + $0x78] sm:$0xff]  ;;  %p286_p4 = scmp.lt.s32.totalorder %s284_s21, %s280_s20 }
  0x2d   :  { %v223_v22 = vpack.c.bf16 %v58_v21, %v57_v20  ;;  %v226_v25 = vpack.c.bf16 %v60_v24, %v59_v23  ;;  %v44_v26 = vld [vmem:[#allocation2] sm:$0x1] }
  0x2e   :  { %v61_v27 = vld [vmem:[%s392_s2] sm:$0x1]  ;;  %p287_p5 = por %p286_p4, %p285_p3 }
  0x2f   :  { %209 = vmatpush3.bf16.msra.mxu0 %v208_v7  ;;  %v132_v29 = vld [vmem:[%s393_s3] sm:$0x1] }
  0x30   :  { %210 = vmatprep.subr.bf16.mxu0 %v312_v0  ;;  %p288_p6 = pnand %p287_p5, %p281_p2 }
  0x33   :  { %212 = vmatpush3.bf16.msra.mxu0 %v211_v10 }
  0x34   :  { %213 = vmatprep.subr.bf16.mxu0 %v312_v0 }
  0x37   :  { %215 = vmatpush3.bf16.msra.mxu0 %v214_v13 }
  0x38   :  { %216 = vmatprep.subr.bf16.mxu0 %v312_v0 }
  0x3b   :  { %218 = vmatpush3.bf16.msra.mxu0 %v217_v16 }
  0x3c   :  { %219 = vmatprep.subr.bf16.mxu0 %v312_v0 }
  0x3f   :  { %221 = vmatpush3.bf16.msra.mxu0 %v220_v19 }
  0x40   :  { %222 = vmatprep.subr.bf16.mxu0 %v312_v0 }
  0x43   :  { %224 = vmatpush3.bf16.msra.mxu0 %v223_v22 }
  0x44   :  { %225 = vmatprep.subr.bf16.mxu0 %v312_v0 }
  0x47   :  { %227 = vmatpush3.bf16.msra.mxu0 %v226_v25 }
  0x4a   :  { %202 = vmatmul.mubr.f32.vlgmr.msra.gmra.mrb[0].mxu0 %v44_v26 }
 0x11d   :  { %v128_v28 = vpop.f32.mrb[0].mxu0 }
 0x11e   :  { %v129_v30 = vadd.f32 %v128_v28, %v61_v27  ;;  %v203_v31 = vpop.f32.mrb[1].mxu0 }
 0x120   :  { %v133_v32 = vadd.f32 %v132_v29, %v129_v30 }
 0x122   :  { %v134_v33 = vmax.f32 %v133_v32, 0.0 }
 0x124   :  { %135 = vst [vmem:[#allocation7] sm:$0x1] %v134_v33 }
 0x125   :  { %291 = shalt.err (!%p288_p6)
}
 0x126   :  { %s292_s3 = scalar_lea.hbm %s394_s4, 16 }
 0x127   :  { %p293_p7 = scmp.ne.s32.totalorder %s394_s4, %s292_s3  ;;  %p296_p8 = scmp.lt.u32.totalorder %s292_s3, %s394_s4 }
 0x129   :  { %p298_p9 = pnand %p296_p8, %p293_p7 }
 0x12b   :  { %301 = shalt.err (!%p298_p9)
}
 0x12c   :  { %145 = dma.vmem_to_hbm [thread:$0]  %s143_s19, 16, %s394_s4, [#allocation4]  }
 0x12d   :  { %306 = dma.done.wait [#allocation4], 16  }
 0x12e   :  { %307 = vsyncadd [#allocation4], 4294967280 }
 0x12f   :  { %149 = vsyncpa [#allocation3], 1 }
 0x130   :  { %150 = vsyncpa [#allocation6], 1 }
 0x131   :  { %151 = vsyncpa [#allocation4], 1 }

</bundles_post_ra>
